<compile_context>
chip_gen: v7x
topology: tpu7x:2x2x1
jax: 0.10.0
libtpu: 0.0.40
codegen_flags: <defaults>
</compile_context>

<pallas_src>
import functools

import jax
import jax.numpy as jnp
import numpy as np
from jax.experimental import pallas as pl
from jax.experimental.pallas import tpu as pltpu

LANE = 128          # TPU lane width (output padded to a multiple of this)
MAX_BLOCK_M = 256   # batch rows per grid step (matches v6e/v7x 256-wide MXU)


def actor_kernel(scale_ref, x_ref, w1_ref, b1_ref, w2_ref, b2_ref,
                 w3_ref, b3_ref, o_ref):
    x = x_ref[...]

    # Layer 1: Linear + ReLU (MXU matmul, f32 accumulate)
    h = jnp.dot(x, w1_ref[...], preferred_element_type=jnp.float32) + b1_ref[...]
    h = jnp.maximum(h, 0.0)

    # Layer 2: Linear + ReLU
    h = jnp.dot(h, w2_ref[...], preferred_element_type=jnp.float32) + b2_ref[...]
    h = jnp.maximum(h, 0.0)

    # Layer 3: Linear (output lanes padded to a multiple of 128 -> lane-dense store)
    h = jnp.dot(h, w3_ref[...], preferred_element_type=jnp.float32) + b3_ref[...]

    # torch.sigmoid(x) * state[0, -1] -- the scalar is hoisted by the wrapper
    # into SMEM so every batch block uses batch-row-0's value.
    scale = scale_ref[0, 0]
    o_ref[...] = (jax.nn.sigmoid(h) * scale).astype(o_ref.dtype)


def prepare_actor_params(w1, b1, w2, b2, w3, b3):
    """One-time layout prep, OUTSIDE the per-call hot path.

    - Weights stored as [in, out] so the kernel computes x @ W (no transpose
      ops are emitted per forward call).
    - Biases stored as [1, out] for direct VMEM broadcast.
    - Final layer padded along the output axis to a multiple of 128 lanes so
      the kernel's output stores are unmasked (lane-dense).
    Returns (params_tuple, action_dim).
    """
    action_dim = w3.shape[0]
    a_pad = ((action_dim + LANE - 1) // LANE) * LANE
    w3t = jnp.zeros((w3.shape[1], a_pad), w3.dtype).at[:, :action_dim].set(w3.T)
    b3r = jnp.zeros((1, a_pad), b3.dtype).at[:, :action_dim].set(b3[None, :])
    params = (w1.T, b1[None, :], w2.T, b2[None, :], w3t, b3r)
    return params, action_dim


@functools.partial(jax.jit, static_argnames=("action_dim",))
def actor_forward(state, params, action_dim):
    """state: [B, state_dim]; params: output of prepare_actor_params."""
    w1t, b1r, w2t, b2r, w3t, b3r = params
    B, state_dim = state.shape
    a_pad = w3t.shape[1]

    # Batch tiling: full batch as one block when small, else 256-row tiles
    # streamed through a parallel grid (weights stay resident in VMEM).
    block_m = B if B < MAX_BLOCK_M else MAX_BLOCK_M
    grid = (pl.cdiv(B, block_m),)

    # Hoist state[0, -1] out of the tensor path: (1, 1) f32 scalar in SMEM.
    scale = state[0, state_dim - 1].reshape(1, 1)

    const = lambda shape: pl.BlockSpec(shape, lambda i: (0, 0))  # resident block

    out_padded = pl.pallas_call(
        actor_kernel,
        out_shape=jax.ShapeDtypeStruct((B, a_pad), state.dtype),
        grid=grid,
        in_specs=[
            pl.BlockSpec(memory_space=pltpu.MemorySpace.SMEM),          # scale
            pl.BlockSpec((block_m, state_dim), lambda i: (i, 0)),        # state tile
            const(w1t.shape), const(b1r.shape),                          # layer 1
            const(w2t.shape), const(b2r.shape),                          # layer 2
            const(w3t.shape), const(b3r.shape),                          # layer 3 (padded)
        ],
        out_specs=pl.BlockSpec((block_m, a_pad), lambda i: (i, 0)),
        compiler_params=pltpu.CompilerParams(
            dimension_semantics=("parallel",)),
    )(scale, state, w1t, b1r, w2t, b2r, w3t, b3r)

    return out_padded[:, :action_dim]


def init_linear(key, out_dim, in_dim, dtype=jnp.float32):
    # Deterministic init mirroring nn.Linear's uniform(-1/sqrt(fan_in), ...).
    kw, kb = jax.random.split(key)
    bound = 1.0 / np.sqrt(in_dim)
    w = jax.random.uniform(kw, (out_dim, in_dim), dtype, -bound, bound)
    b = jax.random.uniform(kb, (out_dim,), dtype, -bound, bound)
    return w, b


def actor_reference(state, w1, b1, w2, b2, w3, b3):
    x = jnp.maximum(state @ w1.T + b1, 0.0)
    x = jnp.maximum(x @ w2.T + b2, 0.0)
    x = x @ w3.T + b3
    return jax.nn.sigmoid(x) * state[0, -1]


if __name__ == "__main__":
    key = jax.random.PRNGKey(0)
    k_state, k_big, k1, k2, k3 = jax.random.split(key, 5)

    # Small shapes consistent with the module.
    batch = 2
    state_dim = 8
    action_dim = 4
    hidden = 32

    state = jax.random.normal(k_state, (batch, state_dim), jnp.float32)
    w1, b1 = init_linear(k1, hidden, state_dim)
    w2, b2 = init_linear(k2, hidden, hidden)
    w3, b3 = init_linear(k3, action_dim, hidden)

    # One-time parameter layout prep (outside the hot path).
    params, adim = prepare_actor_params(w1, b1, w2, b2, w3, b3)

    # --- small-batch check (single grid step, block == full batch) ---
    out = actor_forward(state, params, action_dim=adim)
    out = jax.block_until_ready(out)
    ref = actor_reference(state, w1, b1, w2, b2, w3, b3)
    assert out.shape == (batch, action_dim)
    np.testing.assert_allclose(np.asarray(out), np.asarray(ref), rtol=1e-5, atol=1e-5)

    # --- batched check: many actor evaluations amortized in ONE pallas_call
    #     (grid of 2 x 256-row blocks, weights resident, parallel over batch) ---
    big_batch = 512
    big_state = jax.random.normal(k_big, (big_batch, state_dim), jnp.float32)
    out_big = actor_forward(big_state, params, action_dim=adim)
    out_big = jax.block_until_ready(out_big)
    ref_big = actor_reference(big_state, w1, b1, w2, b2, w3, b3)
    assert out_big.shape == (big_batch, action_dim)
    np.testing.assert_allclose(np.asarray(out_big), np.asarray(ref_big),
                               rtol=1e-5, atol=1e-5)

    print("KERNEL_OK")
</pallas_src>

<mosaic_0001>
module attributes {stable_mosaic.version = 11 : i64} {
  func.func @actor_kernel(%arg0: i32, %arg1: memref<1x1xf32, #tpu.memory_space<smem>>, %arg2: memref<2x8xf32, #tpu.memory_space<vmem>>, %arg3: memref<8x32xf32, #tpu.memory_space<vmem>>, %arg4: memref<1x32xf32, #tpu.memory_space<vmem>>, %arg5: memref<32x32xf32, #tpu.memory_space<vmem>>, %arg6: memref<1x32xf32, #tpu.memory_space<vmem>>, %arg7: memref<32x128xf32, #tpu.memory_space<vmem>>, %arg8: memref<1x128xf32, #tpu.memory_space<vmem>>, %arg9: memref<2x128xf32, #tpu.memory_space<vmem>>) attributes {dimension_semantics = [#tpu.dimension_semantics<parallel>], iteration_bounds = array<i64: 1>, scalar_prefetch = 0 : i64, scratch_operands = 0 : i64, tpu.core_type = #tpu.core_type<tc>, window_params = [{transform_indices = @transform_0, window_bounds = array<i64: 1, 1>}, {transform_indices = @transform_1, window_bounds = array<i64: 2, 8>}, {pipeline_mode = #tpu.pipeline_mode<synchronous>, transform_indices = @transform_2, window_bounds = array<i64: 8, 32>}, {pipeline_mode = #tpu.pipeline_mode<synchronous>, transform_indices = @transform_3, window_bounds = array<i64: 1, 32>}, {pipeline_mode = #tpu.pipeline_mode<synchronous>, transform_indices = @transform_4, window_bounds = array<i64: 32, 32>}, {pipeline_mode = #tpu.pipeline_mode<synchronous>, transform_indices = @transform_5, window_bounds = array<i64: 1, 32>}, {pipeline_mode = #tpu.pipeline_mode<synchronous>, transform_indices = @transform_6, window_bounds = array<i64: 32, 128>}, {pipeline_mode = #tpu.pipeline_mode<synchronous>, transform_indices = @transform_7, window_bounds = array<i64: 1, 128>}, {transform_indices = @transform_8, window_bounds = array<i64: 2, 128>}]} {
    %c0 = arith.constant 0 : index
    %c0_0 = arith.constant 0 : index
    %0 = vector.load %arg2[%c0, %c0_0] : memref<2x8xf32, #tpu.memory_space<vmem>>, vector<2x8xf32>
    %c0_1 = arith.constant 0 : index
    %c0_2 = arith.constant 0 : index
    %1 = vector.load %arg3[%c0_1, %c0_2] : memref<8x32xf32, #tpu.memory_space<vmem>>, vector<8x32xf32>
    %cst = arith.constant dense<0.000000e+00> : vector<2x32xf32>
    %2 = tpu.matmul %0, %1, %cst {dimension_numbers = #tpu.dot_dimension_numbers<[1], [0], [0], [1], [0, 0, 1, 1], [], []>} : vector<2x8xf32>, vector<8x32xf32>, vector<2x32xf32> -> vector<2x32xf32>
    %c0_3 = arith.constant 0 : index
    %c0_4 = arith.constant 0 : index
    %3 = vector.load %arg4[%c0_3, %c0_4] : memref<1x32xf32, #tpu.memory_space<vmem>>, vector<1x32xf32>
    %4 = vector.broadcast %3 : vector<1x32xf32> to vector<2x32xf32>
    %5 = arith.addf %2, %4 : vector<2x32xf32>
    %cst_5 = arith.constant 0.000000e+00 : f32
    %6 = vector.broadcast %cst_5 : f32 to vector<2x32xf32>
    %7 = arith.maximumf %5, %6 : vector<2x32xf32>
    %c0_6 = arith.constant 0 : index
    %c0_7 = arith.constant 0 : index
    %8 = vector.load %arg5[%c0_6, %c0_7] : memref<32x32xf32, #tpu.memory_space<vmem>>, vector<32x32xf32>
    %cst_8 = arith.constant dense<0.000000e+00> : vector<2x32xf32>
    %9 = tpu.matmul %7, %8, %cst_8 {dimension_numbers = #tpu.dot_dimension_numbers<[1], [0], [0], [1], [0, 0, 1, 1], [], []>} : vector<2x32xf32>, vector<32x32xf32>, vector<2x32xf32> -> vector<2x32xf32>
    %c0_9 = arith.constant 0 : index
    %c0_10 = arith.constant 0 : index
    %10 = vector.load %arg6[%c0_9, %c0_10] : memref<1x32xf32, #tpu.memory_space<vmem>>, vector<1x32xf32>
    %11 = vector.broadcast %10 : vector<1x32xf32> to vector<2x32xf32>
    %12 = arith.addf %9, %11 : vector<2x32xf32>
    %cst_11 = arith.constant 0.000000e+00 : f32
    %13 = vector.broadcast %cst_11 : f32 to vector<2x32xf32>
    %14 = arith.maximumf %12, %13 : vector<2x32xf32>
    %c0_12 = arith.constant 0 : index
    %c0_13 = arith.constant 0 : index
    %15 = vector.load %arg7[%c0_12, %c0_13] : memref<32x128xf32, #tpu.memory_space<vmem>>, vector<32x128xf32>
    %cst_14 = arith.constant dense<0.000000e+00> : vector<2x128xf32>
    %16 = tpu.matmul %14, %15, %cst_14 {dimension_numbers = #tpu.dot_dimension_numbers<[1], [0], [0], [1], [0, 0, 1, 1], [], []>} : vector<2x32xf32>, vector<32x128xf32>, vector<2x128xf32> -> vector<2x128xf32>
    %c0_15 = arith.constant 0 : index
    %c0_16 = arith.constant 0 : index
    %17 = vector.load %arg8[%c0_15, %c0_16] : memref<1x128xf32, #tpu.memory_space<vmem>>, vector<1x128xf32>
    %18 = vector.broadcast %17 : vector<1x128xf32> to vector<2x128xf32>
    %19 = arith.addf %16, %18 : vector<2x128xf32>
    %c0_17 = arith.constant 0 : index
    %c0_18 = arith.constant 0 : index
    %20 = memref.load %arg1[%c0_17, %c0_18] : memref<1x1xf32, #tpu.memory_space<smem>>
    %21 = arith.negf %19 : vector<2x128xf32>
    %22 = math.exp %21 : vector<2x128xf32>
    %cst_19 = arith.constant 1.000000e+00 : f32
    %23 = vector.broadcast %cst_19 : f32 to vector<2x128xf32>
    %24 = arith.addf %23, %22 : vector<2x128xf32>
    %25 = arith.divf %23, %24 : vector<2x128xf32>
    %26 = vector.broadcast %20 : f32 to vector<2x128xf32>
    %27 = arith.mulf %25, %26 : vector<2x128xf32>
    %c0_20 = arith.constant 0 : index
    %c0_21 = arith.constant 0 : index
    %28 = vector.load %arg9[%c0_20, %c0_21] : memref<2x128xf32, #tpu.memory_space<vmem>>, vector<2x128xf32>
    tpu.vector_store %arg9[%c0_20, %c0_21], %27 {strides = array<i32>} : memref<2x128xf32, #tpu.memory_space<vmem>>, vector<2x128xf32>,
    return
  }
  func.func @transform_0(%arg0: i32) -> (i32, i32) {
    %c0_i32 = arith.constant 0 : i32
    %c0_i32_0 = arith.constant 0 : i32
    %c0_i32_1 = arith.constant 0 : i32
    return %c0_i32, %c0_i32_0 : i32, i32
  }
  func.func @transform_1(%arg0: i32) -> (i32, i32) {
    %c0_i32 = arith.constant 0 : i32
    %c0_i32_0 = arith.constant 0 : i32
    return %arg0, %c0_i32 : i32, i32
  }
  func.func @transform_2(%arg0: i32) -> (i32, i32) {
    %c0_i32 = arith.constant 0 : i32
    %c0_i32_0 = arith.constant 0 : i32
    %c0_i32_1 = arith.constant 0 : i32
    return %c0_i32, %c0_i32_0 : i32, i32
  }
  func.func @transform_3(%arg0: i32) -> (i32, i32) {
    %c0_i32 = arith.constant 0 : i32
    %c0_i32_0 = arith.constant 0 : i32
    %c0_i32_1 = arith.constant 0 : i32
    return %c0_i32, %c0_i32_0 : i32, i32
  }
  func.func @transform_4(%arg0: i32) -> (i32, i32) {
    %c0_i32 = arith.constant 0 : i32
    %c0_i32_0 = arith.constant 0 : i32
    %c0_i32_1 = arith.constant 0 : i32
    return %c0_i32, %c0_i32_0 : i32, i32
  }
  func.func @transform_5(%arg0: i32) -> (i32, i32) {
    %c0_i32 = arith.constant 0 : i32
    %c0_i32_0 = arith.constant 0 : i32
    %c0_i32_1 = arith.constant 0 : i32
    return %c0_i32, %c0_i32_0 : i32, i32
  }
  func.func @transform_6(%arg0: i32) -> (i32, i32) {
    %c0_i32 = arith.constant 0 : i32
    %c0_i32_0 = arith.constant 0 : i32
    %c0_i32_1 = arith.constant 0 : i32
    return %c0_i32, %c0_i32_0 : i32, i32
  }
  func.func @transform_7(%arg0: i32) -> (i32, i32) {
    %c0_i32 = arith.constant 0 : i32
    %c0_i32_0 = arith.constant 0 : i32
    %c0_i32_1 = arith.constant 0 : i32
    return %c0_i32, %c0_i32_0 : i32, i32
  }
  func.func @transform_8(%arg0: i32) -> (i32, i32) {
    %c0_i32 = arith.constant 0 : i32
    %c0_i32_0 = arith.constant 0 : i32
    return %arg0, %c0_i32 : i32, i32
  }
}

</mosaic_0001>

<bundles_post_ra>
// kernel: actor_forward.1
= control target key start
LH: loop header
LB: loop body
LE: loop exit
PB: predicated region body
PF: predicated region fallthrough
CT: control target
= control target key end

     0   :  { %14 = vsyncpa [#allocation4], 0  ;;  %s638_s0 = inlined_call_operand.<no memory space> [shape: f32[1,1], index: 0, kind: input, shape index: {}]   ;;  %s639_s1 = inlined_call_operand.vmem [shape: f32[2,8], index: 1, kind: input, shape index: {}]   ;;  %s640_s2 = inlined_call_operand.hbm [shape: f32[8,32], index: 2, kind: input, shape index: {}]   ;;  %s641_s3 = inlined_call_operand.vmem [shape: f32[1,32], index: 3, kind: input, shape index: {}]   ;;  %s642_s4 = inlined_call_operand.hbm [shape: f32[32,32], index: 4, kind: input, shape index: {}]   ;;  %s643_s5 = inlined_call_operand.vmem [shape: f32[1,32], index: 5, kind: input, shape index: {}]   ;;  %s644_s6 = inlined_call_operand.hbm [shape: f32[32,128], index: 6, kind: input, shape index: {}]   ;;  %s645_s7 = inlined_call_operand.vmem [shape: f32[1,128], index: 7, kind: input, shape index: {}]   ;;  %s646_s8 = inlined_call_operand.hbm [shape: f32[2,128], index: 8, kind: output, shape index: {}]  }
   0x1   :  { %15 = vsyncpa [#allocation7], 0 }
   0x2   :  { %16 = vsyncpa [#allocation5], 0  ;;  %s515_s27 = smov [#allocation6]   ;;  %s421_s9 = scalar_lea.hbm %s642_s4, 512 }
   0x3   :  { %s38_s28 = sshll.u32 %s515_s27, 4  ;;  %p422_p0 = scmp.ne.s32.totalorder %s642_s4, %s421_s9  ;;  %s39_s28 = int_to_ptr.vmem [resolvable:$true] %s38_s28 }
   0x4   :  { %p425_p1 = scmp.lt.u32.totalorder %s421_s9, %s642_s4 }
   0x6   :  { %p427_p2 = pnand %p425_p1, %p422_p0 }
   0x8   :  { %430 = shalt.err (!%p427_p2)
}
   0x9   :  { %s431_s14 = scalar_lea.vmem %s39_s28, 512  ;;  %p436_p4 = scmp.lt.s32.totalorder %s39_s28, %s39_s28 }
   0xa   :  { %p432_p3 = scmp.ne.s32.totalorder %s39_s28, %s431_s14  ;;  %p437_p5 = scmp.lt.s32.totalorder %s431_s14, %s431_s14 }
   0xc   :  { %p438_p6 = por %p437_p5, %p436_p4 }
   0xe   :  { %p439_p7 = pnand %p438_p6, %p432_p3 }
  0x10   :  { %442 = shalt.err (!%p439_p7)
}
  0x11   :  { %s516_s15 = smov 128   ;;  %s517_s16 = smov 8  }
  0x12   :  { %44 = dma.hbm_to_vmem [thread:$0]  %s642_s4, 512, %s39_s28, [#allocation7], %s516_s15, %s516_s15, %s517_s16  }
  0x13   :  { %s518_s19 = smov [#allocation3]   ;;  %s519_s21 = smov [#allocation8]  }
  0x14   :  { %s27_s20 = sshll.u32 %s518_s19, 4  ;;  %s52_s22 = sshll.u32 %s519_s21, 4  ;;  %s28_s20 = int_to_ptr.vmem [resolvable:$true] %s27_s20  ;;  %s53_s22 = int_to_ptr.vmem [resolvable:$true] %s52_s22 }
  0x15   :  { %s443_s25 = scalar_lea.hbm %s640_s2, 128 }
  0x16   :  { %p444_p8 = scmp.ne.s32.totalorder %s640_s2, %s443_s25  ;;  %p447_p9 = scmp.lt.u32.totalorder %s443_s25, %s640_s2 }
  0x18   :  { %p449_p10 = pnand %p447_p9, %p444_p8 }
  0x1a   :  { %452 = shalt.err (!%p449_p10)
}
  0x1b   :  { %s453_s4 = scalar_lea.vmem %s28_s20, 128  ;;  %p458_p12 = scmp.lt.s32.totalorder %s28_s20, %s28_s20 }
  0x1c   :  { %p454_p11 = scmp.ne.s32.totalorder %s28_s20, %s453_s4  ;;  %p459_p13 = scmp.lt.s32.totalorder %s453_s4, %s453_s4 }
  0x1e   :  { %p460_p0 = por %p459_p13, %p458_p12 }
  0x20   :  { %p461_p1 = pnand %p460_p0, %p454_p11 }
  0x22   :  { %464 = shalt.err (!%p461_p1)
}
  0x23   :  { %30 = dma.hbm_to_vmem [thread:$0]  %s640_s2, 128, %s28_s20, [#allocation4]  }
  0x24   :  { %s465_s12 = scalar_lea.hbm %s644_s6, 512 }
  0x25   :  { %p466_p2 = scmp.ne.s32.totalorder %s644_s6, %s465_s12  ;;  %p469_p3 = scmp.lt.u32.totalorder %s465_s12, %s644_s6 }
  0x27   :  { %p471_p4 = pnand %p469_p3, %p466_p2 }
  0x29   :  { %474 = shalt.err (!%p471_p4)
}
  0x2a   :  { %s475_s19 = scalar_lea.vmem %s53_s22, 512  ;;  %p480_p6 = scmp.lt.s32.totalorder %s53_s22, %s53_s22 }
  0x2b   :  { %p476_p5 = scmp.ne.s32.totalorder %s53_s22, %s475_s19  ;;  %p481_p7 = scmp.lt.s32.totalorder %s475_s19, %s475_s19 }
  0x2d   :  { %p482_p8 = por %p481_p7, %p480_p6 }
  0x2f   :  { %p483_p9 = pnand %p482_p8, %p476_p5 }
  0x31   :  { %486 = shalt.err (!%p483_p9)
}
  0x32   :  { %58 = dma.hbm_to_vmem [thread:$0]  %s644_s6, 512, %s53_s22, [#allocation7], %s516_s15, %s516_s15, %s517_s16  }
  0x33   :  { %509 = dma.done.wait [#allocation4], 128  }
  0x34   :  { %510 = vsyncadd [#allocation4], 4294967168 }
  0x35   :  { %511 = dma.done.wait [#allocation7], 1024  }
  0x36   :  { %512 = vsyncadd [#allocation7], 4294966272  ;;  %v520_v0 = vmov 0.0   ;;  %vm521_vm0 = vmmov 0   ;;  %v522_v1 = vmov 0.0|0.0   ;;  %vm79_vm1 = vcmask 64512  }
  0x37   :  { %369 = vmatprep.subr.mxu0 %v520_v0  ;;  %371 = vmatprep.mubr.msk.f32.mxu0 %vm521_vm0, %v520_v0  ;;  %v71_v2 = vld [vmem:[#allocation3] sm:$0xff]  ;;  %v154_v4 = vld [vmem:[#allocation6] sm:$0xff]  ;;  %v155_v5 = vld [vmem:[#allocation6 + $0x8] sm:$0xff]  ;;  %vm165_vm2 = vcmask 261120   ;;  %v331_v33 = vstv %s638_s0 }
  0x38   :  { %396 = vmatprep.subr.bf16.mxu1 %v522_v1  ;;  %382 = vmatprep.mubr.msk.f32.mxu1 %vm521_vm0, %v520_v0  ;;  %v70_v3 = vld [vmem:[%s639_s1] sm:$0x3]  ;;  %v397_v6 = vpack.c.bf16 %v155_v5, %v154_v4  ;;  %v156_v7 = vld [vmem:[#allocation6 + $0x10] sm:$0xff]  ;;  %v240_v10 = vld [vmem:[#allocation8] sm:$0xff] }
  0x39   :  { %370 = vmatpush3.msra.mxu0 %v71_v2  ;;  %v157_v8 = vld [vmem:[#allocation6 + $0x18] sm:$0xff]  ;;  %v241_v11 = vld [vmem:[#allocation8 + $0x8] sm:$0xff]  ;;  %v242_v18 = vld [vmem:[#allocation8 + $0x10] sm:$0xff] }
  0x3a   :  { %372 = vmatmul.mubr.msk.f32.vlgmr.msra.gmra.mrb[0].mxu0 %vm79_vm1, %v70_v3  ;;  %402 = vmatprep.subr.bf16.mxu0 %v522_v1  ;;  %v400_v9 = vpack.c.bf16 %v157_v8, %v156_v7  ;;  %v403_v12 = vpack.c.bf16 %v241_v11, %v240_v10  ;;  %v350_v13 = vld [vmem:[%s641_s3] ss:$0 sm:$0xff] }
  0x3b   :  { %393 = vmatprep.mubr.msk.f32.mxu0 %vm521_vm0, %v520_v0  ;;  %398 = vmatpush3.bf16.msra.mxu1 %v397_v6  ;;  %v243_v19 = vld [vmem:[#allocation8 + $0x18] sm:$0xff] }
  0x3c   :  { %399 = vmatprep.subr.bf16.mxu1 %v522_v1  ;;  %404 = vmatpush3.bf16.msra.mxu0 %v403_v12  ;;  %v406_v20 = vpack.c.bf16 %v243_v19, %v242_v18  ;;  %v352_v21 = vld [vmem:[%s643_s5] ss:$0 sm:$0xff]  ;;  %s523_s5 = smov [#allocation9]  }
  0x3d   :  { %405 = vmatprep.subr.bf16.mxu0 %v522_v1  ;;  %v354_v26 = vld [vmem:[%s645_s7] ss:$0 sm:$0xff]  ;;  %s340_s26 = sshll.u32 %s523_s5, 4  ;;  %s341_s26 = int_to_ptr.vmem [resolvable:$true] %s340_s26 }
  0x3e   :  { %s487_s27 = scalar_lea.vmem %s341_s26, 32  ;;  %p492_p11 = scmp.lt.s32.totalorder %s341_s26, %s341_s26 }
  0x3f   :  { %401 = vmatpush3.bf16.msra.mxu1 %v400_v9  ;;  %p488_p10 = scmp.ne.s32.totalorder %s341_s26, %s487_s27  ;;  %p493_p12 = scmp.lt.s32.totalorder %s487_s27, %s487_s27 }
  0x40   :  { %407 = vmatpush3.bf16.msra.mxu0 %v406_v20 }
  0x41   :  { %p494_p13 = por %p493_p12, %p492_p11 }
  0x43   :  { %p495_p0 = pnand %p494_p13, %p488_p10 }
 0x10d   :  { %v149_v14 = vpop.f32.mrb[0].mxu0 }
 0x10e   :  { %v150_v15 = vadd.f32 %v350_v13, %v149_v14  ;;  %v373_v16 = vpop.f32.mrb[1].mxu0 }
 0x110   :  { %v153_v17 = vmax.f32 %v150_v15, 0.0 }
 0x112   :  { %383 = vmatmul.mubr.msk.f32.vlgmr.msra.gmra.mrb[0].mxu1 %vm165_vm2, %v153_v17 }
 0x1e5   :  { %v235_v22 = vpop.f32.mrb[0].mxu1 }
 0x1e6   :  { %v236_v23 = vadd.f32 %v352_v21, %v235_v22  ;;  %v384_v24 = vpop.f32.mrb[1].mxu1 }
 0x1e8   :  { %v239_v25 = vmax.f32 %v236_v23, 0.0 }
 0x1ea   :  { %394 = vmatmul.mubr.msk.f32.vlgmr.msra.gmra.mrb[2].mxu0 %vm165_vm2, %v239_v25 }
 0x2bd   :  { %v320_v27 = vpop.f32.mrb[2].mxu0 }
 0x2be   :  { %v321_v28 = vadd.f32 %v354_v26, %v320_v27  ;;  %v395_v29 = vpop.f32.mrb[3].mxu0 }
 0x2c0   :  { %v356_v30 = vmul.f32 -1.442695, %v321_v28 }
 0x2c2   :  { %417 = vpow2.f32 %v356_v30 }
 0x2cc   :  { %v418_v31 = vpop.eup %417 }
 0x2cd   :  { %v328_v32 = vadd.f32 1.0, %v418_v31 }
 0x2cf   :  { %419 = vrcp.f32 %v328_v32 }
 0x2d9   :  { %v420_v34 = vpop.eup %419 }
 0x2da   :  { %v332_v35 = vmul.f32 %v420_v34, %v331_v33 }
 0x2dc   :  { %333 = vst [vmem:[#allocation9] sm:$0x3] %v332_v35 }
 0x2dd   :  { %498 = shalt.err (!%p495_p0)
}
 0x2de   :  { %s499_s30 = scalar_lea.hbm %s646_s8, 32 }
 0x2df   :  { %p500_p1 = scmp.ne.s32.totalorder %s646_s8, %s499_s30  ;;  %p503_p2 = scmp.lt.u32.totalorder %s499_s30, %s646_s8 }
 0x2e1   :  { %p505_p3 = pnand %p503_p2, %p500_p1 }
 0x2e3   :  { %508 = shalt.err (!%p505_p3)
}
 0x2e4   :  { %343 = dma.vmem_to_hbm [thread:$0]  %s341_s26, 32, %s646_s8, [#allocation5]  }
 0x2e5   :  { %513 = dma.done.wait [#allocation5], 32  }
 0x2e6   :  { %514 = vsyncadd [#allocation5], 4294967264 }
 0x2e7   :  { %347 = vsyncpa [#allocation4], 1 }
 0x2e8   :  { %348 = vsyncpa [#allocation7], 1 }
 0x2e9   :  { %349 = vsyncpa [#allocation5], 1 }

</bundles_post_ra>
